<compile_context>
chip_gen: v7x
topology: tpu7x:2x2x1
jax: 0.10.0
libtpu: 0.0.40
codegen_flags: <defaults>
</compile_context>

<pallas_src>
import jax
import jax.numpy as jnp
from jax.experimental import pallas as pl
from jax.experimental.pallas import tpu as pltpu


def _group_all_concat_kernel(xyz_ref, feat_ref, out_ref):
    # xyz_ref:  (Bt, 3, N)   -- pre-transposed in the wrapper (lane-dense)
    # feat_ref: (Bt, C, N)
    # out_ref:  (Bt, C+3, N) -- lane/sublane-dense, no degenerate trailing dims
    # Two direct slice stores; no concatenate temporary.
    out_ref[:, 0:3, :] = xyz_ref[...].astype(out_ref.dtype)
    out_ref[:, 3:, :] = feat_ref[...].astype(out_ref.dtype)


def _pick_batch_tile(B, bytes_per_batch, target_bytes=1 << 20):
    """Largest divisor of B whose per-step output tile stays under
    `target_bytes`, while keeping the grid at >= 2 steps (v7x dual-TC
    sharding) whenever B >= 2."""
    best = 1
    for bt in range(1, B + 1):
        if B % bt:
            continue
        if bt * bytes_per_batch > target_bytes:
            continue
        if B >= 2 and (B // bt) < 2:
            continue
        best = bt
    return best


def group_all(xyz, features=None, use_xyz=True, ret_grouped_xyz=False):
    """Pallas/JAX implementation of GroupAll.forward.

    xyz:      (B, N, 3)
    features: (B, C, N) or None
    returns:  (B, C+3, 1, N) if use_xyz and features is not None
              (B, C,   1, N) if not use_xyz and features is not None
              (B, 3,   1, N) if features is None
    If ret_grouped_xyz, also returns grouped_xyz (B, 3, 1, N) for all branches.
    """
    B, N, _ = xyz.shape

    if features is None:
        # Pure transpose + reshape: leave to XLA (no Pallas kernel needed).
        out = jnp.transpose(xyz, (0, 2, 1))[:, :, None, :]
    elif not use_xyz:
        # Pure reshape: leave to XLA.
        out = features[:, :, None, :]
    else:
        C = features.shape[1]
        out_dtype = jnp.promote_types(xyz.dtype, features.dtype)
        itemsize = jnp.dtype(out_dtype).itemsize

        # Tiny (B, 3, N) transpose done by XLA in the wrapper so the kernel is
        # a pure lane-dense copy.
        xyz_t = jnp.transpose(xyz, (0, 2, 1))  # (B, 3, N)

        bt = _pick_batch_tile(B, (C + 3) * N * itemsize)

        bytes_accessed = (B * 3 * N + B * C * N + B * (C + 3) * N) * itemsize

        out3 = pl.pallas_call(
            _group_all_concat_kernel,
            out_shape=jax.ShapeDtypeStruct((B, C + 3, N), out_dtype),
            grid=(B // bt,),
            in_specs=[
                pl.BlockSpec((bt, 3, N), lambda b: (b, 0, 0)),
                pl.BlockSpec((bt, C, N), lambda b: (b, 0, 0)),
            ],
            out_specs=pl.BlockSpec((bt, C + 3, N), lambda b: (b, 0, 0)),
            compiler_params=pltpu.CompilerParams(
                dimension_semantics=("parallel",),
            ),
            cost_estimate=pl.CostEstimate(
                flops=0, transcendentals=0, bytes_accessed=bytes_accessed
            ),
        )(xyz_t, features)

        # Insert the size-1 nsamples dim outside the kernel (free reshape).
        out = out3[:, :, None, :]  # (B, C+3, 1, N)

    if ret_grouped_xyz:
        grouped_xyz = jnp.transpose(xyz, (0, 2, 1))[:, :, None, :]
        return out, grouped_xyz
    return out


def _reference_group_all(xyz, features, use_xyz=True):
    grouped_xyz = jnp.transpose(xyz, (0, 2, 1))[:, :, None, :]  # (B, 3, 1, N)
    if features is not None:
        grouped_features = features[:, :, None, :]              # (B, C, 1, N)
        if use_xyz:
            return jnp.concatenate(
                [grouped_xyz.astype(grouped_features.dtype)
                 if grouped_features.dtype == jnp.promote_types(xyz.dtype, features.dtype)
                 else grouped_xyz,
                 grouped_features], axis=1
            ).astype(jnp.promote_types(xyz.dtype, features.dtype))
        return grouped_features
    return grouped_xyz


if __name__ == "__main__":
    key = jax.random.PRNGKey(0)
    k1, k2 = jax.random.split(key)

    B, N, C = 2, 16, 4
    xyz = jax.random.normal(k1, (B, N, 3), dtype=jnp.float32)       # (B, N, 3)
    features = jax.random.normal(k2, (B, C, N), dtype=jnp.float32)  # (B, C, N)

    # --- concat path (Pallas kernel) ---
    new_features = jax.block_until_ready(group_all(xyz, features, use_xyz=True))
    ref = _reference_group_all(xyz, features, use_xyz=True)
    assert new_features.shape == (B, C + 3, 1, N), new_features.shape
    assert jnp.array_equal(new_features, ref), "mismatch vs reference (concat path)"

    # --- features-only path (pure JAX, no kernel) ---
    feat_only = jax.block_until_ready(group_all(xyz, features, use_xyz=False))
    assert feat_only.shape == (B, C, 1, N)
    assert jnp.array_equal(feat_only, _reference_group_all(xyz, features, use_xyz=False))

    # --- xyz-only path (pure JAX, no kernel) ---
    xyz_only = jax.block_until_ready(group_all(xyz, None))
    assert xyz_only.shape == (B, 3, 1, N)
    assert jnp.array_equal(xyz_only, _reference_group_all(xyz, None))

    # --- ret_grouped_xyz path ---
    out, gxyz = group_all(xyz, features, use_xyz=True, ret_grouped_xyz=True)
    out = jax.block_until_ready(out)
    assert gxyz.shape == (B, 3, 1, N)
    assert jnp.array_equal(gxyz, _reference_group_all(xyz, None))

    print("KERNEL_OK")
</pallas_src>

<mosaic_0001>
module attributes {stable_mosaic.version = 11 : i64} {
  func.func @_group_all_concat_kernel(%arg0: i32, %arg1: memref<1x3x16xf32, #tpu.memory_space<vmem>>, %arg2: memref<1x4x16xf32, #tpu.memory_space<vmem>>, %arg3: memref<1x7x16xf32, #tpu.memory_space<vmem>>) attributes {dimension_semantics = [#tpu.dimension_semantics<parallel>], iteration_bounds = array<i64: 2>, scalar_prefetch = 0 : i64, scratch_operands = 0 : i64, tpu.core_type = #tpu.core_type<tc>, window_params = [{transform_indices = @transform_0, window_bounds = array<i64: 1, 3, 16>}, {transform_indices = @transform_1, window_bounds = array<i64: 1, 4, 16>}, {transform_indices = @transform_2, window_bounds = array<i64: 1, 7, 16>}]} {
    %c0 = arith.constant 0 : index
    %c0_0 = arith.constant 0 : index
    %c0_1 = arith.constant 0 : index
    %0 = vector.load %arg1[%c0, %c0_0, %c0_1] : memref<1x3x16xf32, #tpu.memory_space<vmem>>, vector<1x3x16xf32>
    %c0_2 = arith.constant 0 : index
    %c0_3 = arith.constant 0 : index
    %c0_4 = arith.constant 0 : index
    %1 = vector.load %arg3[%c0_2, %c0_3, %c0_4] : memref<1x7x16xf32, #tpu.memory_space<vmem>>, vector<1x3x16xf32>
    tpu.vector_store %arg3[%c0_2, %c0_3, %c0_4], %0 {strides = array<i32>} : memref<1x7x16xf32, #tpu.memory_space<vmem>>, vector<1x3x16xf32>,
    %c0_5 = arith.constant 0 : index
    %c0_6 = arith.constant 0 : index
    %c0_7 = arith.constant 0 : index
    %2 = vector.load %arg2[%c0_5, %c0_6, %c0_7] : memref<1x4x16xf32, #tpu.memory_space<vmem>>, vector<1x4x16xf32>
    %c0_8 = arith.constant 0 : index
    %c3 = arith.constant 3 : index
    %c0_9 = arith.constant 0 : index
    %3 = vector.load %arg3[%c0_8, %c3, %c0_9] : memref<1x7x16xf32, #tpu.memory_space<vmem>>, vector<1x4x16xf32>
    tpu.vector_store %arg3[%c0_8, %c3, %c0_9], %2 {strides = array<i32>} : memref<1x7x16xf32, #tpu.memory_space<vmem>>, vector<1x4x16xf32>,
    return
  }
  func.func @transform_0(%arg0: i32) -> (i32, i32, i32) {
    %c0_i32 = arith.constant 0 : i32
    %c0_i32_0 = arith.constant 0 : i32
    %c0_i32_1 = arith.constant 0 : i32
    return %arg0, %c0_i32, %c0_i32_0 : i32, i32, i32
  }
  func.func @transform_1(%arg0: i32) -> (i32, i32, i32) {
    %c0_i32 = arith.constant 0 : i32
    %c0_i32_0 = arith.constant 0 : i32
    %c0_i32_1 = arith.constant 0 : i32
    return %arg0, %c0_i32, %c0_i32_0 : i32, i32, i32
  }
  func.func @transform_2(%arg0: i32) -> (i32, i32, i32) {
    %c0_i32 = arith.constant 0 : i32
    %c0_i32_0 = arith.constant 0 : i32
    %c0_i32_1 = arith.constant 0 : i32
    return %arg0, %c0_i32, %c0_i32_0 : i32, i32, i32
  }
}

</mosaic_0001>

<bundles_post_ra>
// kernel: tpu_custom_call.1
= control target key start
LH: loop header
LB: loop body
LE: loop exit
PB: predicated region body
PF: predicated region fallthrough
CT: control target
= control target key end

     0   :  { %s249_s9 = smov 0   ;;  %s277_s0 = inlined_call_operand.vmem [shape: f32[2,3,16], index: 0, kind: input, shape index: {}]   ;;  %s278_s1 = inlined_call_operand.vmem [shape: f32[2,4,16], index: 1, kind: input, shape index: {}]   ;;  %s279_s2 = inlined_call_operand.vmem [shape: f32[2,7,16], index: 2, kind: output, shape index: {}]  }
   0x1 LB: > { %s227_s10 = sadd.s32 4294967295, %s251_s9   ;;  %p231_p0 = scmp.ge.s32.totalorder %s251_s9, 1  ;;  %s251_s9 = sphi %s249_s9, %s12_s9  }
   0x2   : > { %p120_p1 = scmp.lt.s32.totalorder %s251_s9, 3 }
   0x4   : > { %p121_p2 = pnand %p231_p0, %p120_p1 }
   0x5   : > { %p144_p3 = scmp.lt.s32.totalorder (!%p121_p2), %s227_s10, 1  ;;  %vm157_vm0 = vcmask (!%p121_p2), 124928   ;;  %vm160_vm1 = vcmask (!%p121_p2), 125952  }
   0x6   : > { %124 = sbr.rel (%p121_p2) target bundleno = 19 (0x13), region = 28 }
   0xd   : > { %s281_s10 = smov (!%p144_p3, %s227_s10), 1 }
   0xe   : > { %s232_s11 = sshll.u32 %s281_s10, 2  ;;  %s234_s12 = sshll.u32 %s281_s10, 3 }
   0xf   : > { %s147_s15 = scalar_lea.vmem %s277_s0, %s232_s11  ;;  %s155_s18 = scalar_lea.vmem %s279_s2, %s234_s12 }
  0x10   : > { %v156_v0 = vld [vmem:[%s147_s15] sm:$0x7]  ;;  %s151_s21 = scalar_lea.vmem %s278_s1, %s232_s11 }
  0x11   : > { %158 = vst.msk [vmem:[%s155_s18] sm:$0x7] %vm157_vm0, %v156_v0  ;;  %v159_v1 = vld [vmem:[%s151_s21] sm:$0xf] }
  0x12   : > { %161 = vst.msk [vmem:[%s155_s18 + $0x3] sm:$0xf] %vm160_vm1, %v159_v1 }
  0x13 PF: > { %s12_s9 = sadd.s32 1, %s251_s9  }
  0x14   : > { %p9_p4 = scmp.ge.s32.totalorder %s12_s9, 4  }
  0x16   :  { %11 = sbr.rel (!%p9_p4) target bundleno = 1 (0x1), region = 61 }

</bundles_post_ra>
